<compile_context>
chip_gen: v7x
topology: tpu7x:2x2x1
jax: 0.10.0
libtpu: 0.0.40
codegen_flags: <defaults>
</compile_context>

<pallas_src>
import jax
import jax.numpy as jnp
from jax.experimental import pallas as pl
from jax.experimental.pallas import tpu as pltpu


def _perturbation_kernel(s_ref, a_ref, w1_ref, b1_ref, w2_ref, b2_ref, out_ref):
    # Fused concat -> single K=(state_dim+action_dim) matmul (one MXU pass).
    x = jnp.concatenate([s_ref[...], a_ref[...]], axis=1)          # (TB, K) f32
    x = x.astype(w1_ref.dtype)                                      # MXU-native dtype
    h = jnp.dot(x, w1_ref[...], preferred_element_type=jnp.float32)
    h = jnp.maximum(h + b1_ref[...], 0.0)                           # f32 epilogue
    h = h.astype(w2_ref.dtype)                                      # bf16 feed for 2nd dot
    o = jnp.dot(h, w2_ref[...], preferred_element_type=jnp.float32) + b2_ref[...]
    out_ref[...] = 0.05 * jnp.tanh(o)                               # f32 tanh/scale/store


def perturbation_forward(state, action, params, *,
                         compute_dtype=jnp.bfloat16, tile_b=512):
    """state: (B, state_dim), action: (B, action_dim) -> (B, action_dim)."""
    w1, b1, w2, b2 = params
    B, state_dim = state.shape
    action_dim = action.shape[1]
    H = w1.shape[1]
    A = w2.shape[1]

    # Lane-dense output slab: pad the output width up to a multiple of 128.
    # Padded columns see zero weights + zero bias -> tanh(0)=0, sliced off below.
    A_pad = max(128, ((A + 127) // 128) * 128)
    w2p = jnp.zeros((H, A_pad), w2.dtype).at[:, :A].set(w2)
    b2p = jnp.zeros((1, A_pad), jnp.float32).at[:, :A].set(b2.astype(jnp.float32))

    # Matmul operands in MXU-native dtype; biases / epilogue stay f32.
    w1_c = w1.astype(compute_dtype)
    w2_c = w2p.astype(compute_dtype)
    b1_f = b1.astype(jnp.float32)

    # Batch tile: whole batch if small, else 512 rows (multiple of 8) per step.
    TB = B if B <= tile_b else tile_b
    grid = (pl.cdiv(B, TB),)

    def batch_spec(d):
        return pl.BlockSpec((TB, d), lambda i: (i, 0))

    def const_spec(shape):
        return pl.BlockSpec(shape, lambda i: (0, 0))   # resident weights/biases

    out = pl.pallas_call(
        _perturbation_kernel,
        out_shape=jax.ShapeDtypeStruct((B, A_pad), jnp.float32),
        grid_spec=pltpu.PrefetchScalarGridSpec(
            num_scalar_prefetch=0,
            grid=grid,
            in_specs=[
                batch_spec(state_dim),       # state   (TB, S)
                batch_spec(action_dim),      # action  (TB, A)
                const_spec(w1_c.shape),      # W1      (S+A, H)
                const_spec(b1_f.shape),      # b1      (1, H)
                const_spec(w2_c.shape),      # W2 pad  (H, A_pad)
                const_spec(b2p.shape),       # b2 pad  (1, A_pad)
            ],
            out_specs=batch_spec(A_pad),     # out     (TB, A_pad) lane-dense
        ),
        compiler_params=pltpu.CompilerParams(
            dimension_semantics=("parallel",)),
    )(state, action, w1_c, b1_f, w2_c, b2p)

    return out[:, :A]


def init_params(key, state_dim, action_dim, hidden=256):
    """Deterministic synthetic parameters (shapes match the nn.Module)."""
    k1, k2, k3, k4 = jax.random.split(key, 4)
    d_in = state_dim + action_dim
    # PyTorch Linear default init scale: U(-1/sqrt(fan_in), 1/sqrt(fan_in))
    s1 = 1.0 / jnp.sqrt(d_in)
    s2 = 1.0 / jnp.sqrt(hidden)
    w1 = jax.random.uniform(k1, (d_in, hidden), jnp.float32, -s1, s1)
    b1 = jax.random.uniform(k2, (1, hidden), jnp.float32, -s1, s1)
    w2 = jax.random.uniform(k3, (hidden, action_dim), jnp.float32, -s2, s2)
    b2 = jax.random.uniform(k4, (1, action_dim), jnp.float32, -s2, s2)
    return w1, b1, w2, b2


def _reference(state, action, params):
    w1, b1, w2, b2 = params
    x = jnp.concatenate([state, action], axis=1)
    h = jnp.maximum(x @ w1 + b1, 0.0)
    return 0.05 * jnp.tanh(h @ w2 + b2)


if __name__ == "__main__":
    key = jax.random.PRNGKey(0)
    k_s, k_a, k_p = jax.random.split(key, 3)

    batch, state_dim, action_dim = 8, 17, 6
    state = jax.random.normal(k_s, (batch, state_dim), jnp.float32)
    action = jnp.tanh(jax.random.normal(k_a, (batch, action_dim), jnp.float32))
    params = init_params(k_p, state_dim, action_dim)

    ref = _reference(state, action, params)

    # Exactness check: f32 matmul path against the f32 reference.
    fwd_f32 = jax.jit(
        lambda s, a, p: perturbation_forward(s, a, p, compute_dtype=jnp.float32))
    out_f32 = jax.block_until_ready(fwd_f32(state, action, params))
    assert out_f32.shape == (batch, action_dim)
    assert jnp.allclose(out_f32, ref, atol=1e-5, rtol=1e-5), "f32 mismatch vs reference"

    # Deployment path: bf16 matmul operands, f32 accumulate/epilogue.
    fwd = jax.jit(perturbation_forward)
    out = jax.block_until_ready(fwd(state, action, params))
    assert out.shape == (batch, action_dim)
    assert jnp.allclose(out, ref, atol=2e-3, rtol=3e-2), "bf16 mismatch vs reference"

    print("KERNEL_OK")
</pallas_src>

<mosaic_0001>
module attributes {stable_mosaic.version = 11 : i64} {
  func.func @_perturbation_kernel(%arg0: i32, %arg1: memref<8x17xf32, #tpu.memory_space<vmem>>, %arg2: memref<8x6xf32, #tpu.memory_space<vmem>>, %arg3: memref<23x256xf32, #tpu.memory_space<vmem>>, %arg4: memref<1x256xf32, #tpu.memory_space<vmem>>, %arg5: memref<256x128xf32, #tpu.memory_space<vmem>>, %arg6: memref<1x128xf32, #tpu.memory_space<vmem>>, %arg7: memref<8x128xf32, #tpu.memory_space<vmem>>) attributes {dimension_semantics = [#tpu.dimension_semantics<parallel>], iteration_bounds = array<i64: 1>, scalar_prefetch = 0 : i64, scratch_operands = 0 : i64, tpu.core_type = #tpu.core_type<tc>, window_params = [{transform_indices = @transform_0, window_bounds = array<i64: 8, 17>}, {transform_indices = @transform_1, window_bounds = array<i64: 8, 6>}, {pipeline_mode = #tpu.pipeline_mode<synchronous>, transform_indices = @transform_2, window_bounds = array<i64: 23, 256>}, {pipeline_mode = #tpu.pipeline_mode<synchronous>, transform_indices = @transform_3, window_bounds = array<i64: 1, 256>}, {pipeline_mode = #tpu.pipeline_mode<synchronous>, transform_indices = @transform_4, window_bounds = array<i64: 256, 128>}, {pipeline_mode = #tpu.pipeline_mode<synchronous>, transform_indices = @transform_5, window_bounds = array<i64: 1, 128>}, {transform_indices = @transform_6, window_bounds = array<i64: 8, 128>}]} {
    %c0 = arith.constant 0 : index
    %c0_0 = arith.constant 0 : index
    %0 = vector.load %arg1[%c0, %c0_0] : memref<8x17xf32, #tpu.memory_space<vmem>>, vector<8x17xf32>
    %c0_1 = arith.constant 0 : index
    %c0_2 = arith.constant 0 : index
    %1 = vector.load %arg2[%c0_1, %c0_2] : memref<8x6xf32, #tpu.memory_space<vmem>>, vector<8x6xf32>
    %2 = tpu.concatenate %0, %1 in 1 : vector<8x17xf32>, vector<8x6xf32> -> vector<8x23xf32>
    %c0_3 = arith.constant 0 : index
    %c0_4 = arith.constant 0 : index
    %3 = vector.load %arg3[%c0_3, %c0_4] : memref<23x256xf32, #tpu.memory_space<vmem>>, vector<23x256xf32>
    %cst = arith.constant dense<0.000000e+00> : vector<8x256xf32>
    %4 = tpu.matmul %2, %3, %cst {dimension_numbers = #tpu.dot_dimension_numbers<[1], [0], [0], [1], [0, 0, 1, 1], [], []>} : vector<8x23xf32>, vector<23x256xf32>, vector<8x256xf32> -> vector<8x256xf32>
    %c0_5 = arith.constant 0 : index
    %c0_6 = arith.constant 0 : index
    %5 = vector.load %arg4[%c0_5, %c0_6] : memref<1x256xf32, #tpu.memory_space<vmem>>, vector<1x256xf32>
    %6 = vector.broadcast %5 : vector<1x256xf32> to vector<8x256xf32>
    %7 = arith.addf %4, %6 : vector<8x256xf32>
    %cst_7 = arith.constant 0.000000e+00 : f32
    %8 = vector.broadcast %cst_7 : f32 to vector<8x256xf32>
    %9 = arith.maximumf %7, %8 : vector<8x256xf32>
    %c0_8 = arith.constant 0 : index
    %c0_9 = arith.constant 0 : index
    %10 = vector.load %arg5[%c0_8, %c0_9] : memref<256x128xf32, #tpu.memory_space<vmem>>, vector<256x128xf32>
    %cst_10 = arith.constant dense<0.000000e+00> : vector<8x128xf32>
    %11 = tpu.matmul %9, %10, %cst_10 {dimension_numbers = #tpu.dot_dimension_numbers<[1], [0], [0], [1], [0, 0, 1, 1], [], []>} : vector<8x256xf32>, vector<256x128xf32>, vector<8x128xf32> -> vector<8x128xf32>
    %c0_11 = arith.constant 0 : index
    %c0_12 = arith.constant 0 : index
    %12 = vector.load %arg6[%c0_11, %c0_12] : memref<1x128xf32, #tpu.memory_space<vmem>>, vector<1x128xf32>
    %13 = vector.broadcast %12 : vector<1x128xf32> to vector<8x128xf32>
    %14 = arith.addf %11, %13 : vector<8x128xf32>
    %15 = math.tanh %14 : vector<8x128xf32>
    %cst_13 = arith.constant 5.000000e-02 : f32
    %16 = vector.broadcast %cst_13 : f32 to vector<8x128xf32>
    %17 = arith.mulf %16, %15 : vector<8x128xf32>
    %c0_14 = arith.constant 0 : index
    %c0_15 = arith.constant 0 : index
    %18 = vector.load %arg7[%c0_14, %c0_15] : memref<8x128xf32, #tpu.memory_space<vmem>>, vector<8x128xf32>
    tpu.vector_store %arg7[%c0_14, %c0_15], %17 {strides = array<i32>} : memref<8x128xf32, #tpu.memory_space<vmem>>, vector<8x128xf32>,
    return
  }
  func.func @transform_0(%arg0: i32) -> (i32, i32) {
    %c0_i32 = arith.constant 0 : i32
    %c0_i32_0 = arith.constant 0 : i32
    return %arg0, %c0_i32 : i32, i32
  }
  func.func @transform_1(%arg0: i32) -> (i32, i32) {
    %c0_i32 = arith.constant 0 : i32
    %c0_i32_0 = arith.constant 0 : i32
    return %arg0, %c0_i32 : i32, i32
  }
  func.func @transform_2(%arg0: i32) -> (i32, i32) {
    %c0_i32 = arith.constant 0 : i32
    %c0_i32_0 = arith.constant 0 : i32
    %c0_i32_1 = arith.constant 0 : i32
    return %c0_i32, %c0_i32_0 : i32, i32
  }
  func.func @transform_3(%arg0: i32) -> (i32, i32) {
    %c0_i32 = arith.constant 0 : i32
    %c0_i32_0 = arith.constant 0 : i32
    %c0_i32_1 = arith.constant 0 : i32
    return %c0_i32, %c0_i32_0 : i32, i32
  }
  func.func @transform_4(%arg0: i32) -> (i32, i32) {
    %c0_i32 = arith.constant 0 : i32
    %c0_i32_0 = arith.constant 0 : i32
    %c0_i32_1 = arith.constant 0 : i32
    return %c0_i32, %c0_i32_0 : i32, i32
  }
  func.func @transform_5(%arg0: i32) -> (i32, i32) {
    %c0_i32 = arith.constant 0 : i32
    %c0_i32_0 = arith.constant 0 : i32
    %c0_i32_1 = arith.constant 0 : i32
    return %c0_i32, %c0_i32_0 : i32, i32
  }
  func.func @transform_6(%arg0: i32) -> (i32, i32) {
    %c0_i32 = arith.constant 0 : i32
    %c0_i32_0 = arith.constant 0 : i32
    return %arg0, %c0_i32 : i32, i32
  }
}

</mosaic_0001>

<bundles_post_ra>
// kernel: _lambda_.1
= control target key start
LH: loop header
LB: loop body
LE: loop exit
PB: predicated region body
PF: predicated region fallthrough
CT: control target
= control target key end

     0   :  { %s364_s27 = smov 17   ;;  %vm54_vm0 = vcmask 1046528   ;;  %v365_v8 = vmov 0.0   ;;  %s542_s0 = inlined_call_operand.vmem [shape: f32[8,17], index: 0, kind: input, shape index: {}]   ;;  %s543_s1 = inlined_call_operand.vmem [shape: f32[8,6], index: 1, kind: input, shape index: {}]   ;;  %s544_s2 = inlined_call_operand.vmem [shape: f32[23,256], index: 2, kind: input, shape index: {}]   ;;  %s545_s3 = inlined_call_operand.vmem [shape: f32[1,256], index: 3, kind: input, shape index: {}]   ;;  %s546_s4 = inlined_call_operand.vmem [shape: f32[256,128], index: 4, kind: input, shape index: {}]   ;;  %s547_s5 = inlined_call_operand.vmem [shape: f32[1,128], index: 5, kind: input, shape index: {}]   ;;  %s548_s6 = inlined_call_operand.hbm [shape: f32[8,128], index: 6, kind: output, shape index: {}]  }
   0x1   :  { %v25_v0 = vld [vmem:[%s543_s1] sm:$0xff]  ;;  %v33_v1 = vld [vmem:[%s544_s2 + $0x8] sm:$0xff]  ;;  %v35_v2 = vld [vmem:[%s544_s2 + $0x18] sm:$0xff]  ;;  %125 = vmatprep.mubr.f32.mxu0 %v365_v8 }
   0x2   :  { %27 = vrot.lane.b32.xlu0 %v25_v0, %s364_s27  ;;  %v299_v3 = vpack.c.bf16 %v35_v2, %v33_v1  ;;  %v32_v4 = vld [vmem:[%s544_s2] sm:$0xff]  ;;  %v34_v5 = vld [vmem:[%s544_s2 + $0x10] sm:$0xff]  ;;  %v37_v7 = vld [vmem:[%s544_s2 + $0x28] sm:$0x7f] }
   0x3   :  { %v301_v6 = vpack.c.bf16 %v34_v5, %v32_v4  ;;  %v150_v9 = vld [vmem:[%s546_s4 + $0x80] sm:$0xff]  ;;  %v151_v11 = vld [vmem:[%s546_s4 + $0x88] sm:$0xff]  ;;  %v152_v16 = vld [vmem:[%s546_s4 + $0x90] sm:$0xff] }
   0x4   :  { %300 = vmatprep.subr.bf16.mxu0 %v299_v3  ;;  %v36_v10 = vld [vmem:[%s544_s2 + $0x20] sm:$0x7f]  ;;  %v135_v13 = vld [vmem:[%s546_s4 + $0x8] sm:$0xff]  ;;  %v303_v14 = vpack.c.bf16 %v151_v11, %v150_v9  ;;  %v153_v17 = vld [vmem:[%s546_s4 + $0x98] sm:$0xff] }
   0x5   :  { %v134_v12 = vld [vmem:[%s546_s4] sm:$0xff]  ;;  %302 = vmatpush1.bf16.msra.mxu0 %v301_v6  ;;  %v136_v18 = vld [vmem:[%s546_s4 + $0x10] sm:$0xff]  ;;  %v307_v19 = vpack.c.bf16 %v153_v17, %v152_v16  ;;  %v137_v20 = vld [vmem:[%s546_s4 + $0x18] sm:$0xff] }
   0x6   :  { %v305_v15 = vpack.c.bf16 %v135_v13, %v134_v12  ;;  %260 = vmatprep.subr.msk.mxu0 %vm54_vm0, %v37_v7  ;;  %v154_v21 = vld [vmem:[%s546_s4 + $0xa0] sm:$0xff]  ;;  %v155_v22 = vld [vmem:[%s546_s4 + $0xa8] sm:$0xff]  ;;  %304 = vmatprep.subr.bf16.mxu1 %v303_v14  ;;  %v309_v23 = vpack.c.bf16 %v137_v20, %v136_v18  ;;  %v156_v27 = vld [vmem:[%s546_s4 + $0xb0] sm:$0xff] }
   0x7   :  { %v311_v24 = vpack.c.bf16 %v155_v22, %v154_v21  ;;  %v138_v25 = vld [vmem:[%s546_s4 + $0x20] sm:$0xff]  ;;  %v139_v26 = vld [vmem:[%s546_s4 + $0x28] sm:$0xff]  ;;  %v157_v28 = vld [vmem:[%s546_s4 + $0xb8] sm:$0xff] }
   0x8   :  { %306 = vmatpush3.bf16.msra.mxu1 %v305_v15  ;;  %v313_v29 = vpack.c.bf16 %v139_v26, %v138_v25 }
   0x9   :  { %261 = vmatpush1.msk.msra.mxu0 %vm54_vm0, %v36_v10  ;;  %308 = vmatprep.subr.bf16.mxu1 %v307_v19 }
   0xc   :  { %310 = vmatpush3.bf16.msra.mxu1 %v309_v23 }
   0xd   :  { %11 = vsyncpa [#allocation3], 0  ;;  %312 = vmatprep.subr.bf16.mxu1 %v311_v24  ;;  %v315_v30 = vpack.c.bf16 %v157_v28, %v156_v27  ;;  %v140_v31 = vld [vmem:[%s546_s4 + $0x30] sm:$0xff]  ;;  %v141_v32 = vld [vmem:[%s546_s4 + $0x38] sm:$0xff]  ;;  %vm30_vm1 = vcmask 138240   ;;  %vm50_vm2 = vcmask 187392   ;;  %v40_v61 = vlaneseq }
   0xe   :  { %v158_v33 = vld [vmem:[%s546_s4 + $0xc0] sm:$0xff]  ;;  %v159_v34 = vld [vmem:[%s546_s4 + $0xc8] sm:$0xff]  ;;  %v317_v35 = vpack.c.bf16 %v141_v32, %v140_v31  ;;  %v160_v39 = vld [vmem:[%s546_s4 + $0xd0] sm:$0xff] }
   0xf   :  { %v319_v36 = vpack.c.bf16 %v159_v34, %v158_v33  ;;  %v142_v37 = vld [vmem:[%s546_s4 + $0x40] sm:$0xff]  ;;  %v143_v38 = vld [vmem:[%s546_s4 + $0x48] sm:$0xff]  ;;  %v161_v40 = vld [vmem:[%s546_s4 + $0xd8] sm:$0xff]  ;;  %v41_v62 = vshrl.u32 %v40_v61, 7 }
  0x10   :  { %314 = vmatpush3.bf16.msra.mxu1 %v313_v29  ;;  %v321_v41 = vpack.c.bf16 %v143_v38, %v142_v37  ;;  %v323_v42 = vpack.c.bf16 %v161_v40, %v160_v39  ;;  %v144_v43 = vld [vmem:[%s546_s4 + $0x50] sm:$0xff]  ;;  %v145_v44 = vld [vmem:[%s546_s4 + $0x58] sm:$0xff]  ;;  %v162_v45 = vld [vmem:[%s546_s4 + $0xe0] sm:$0xff] }
  0x11   :  { %316 = vmatprep.subr.bf16.mxu1 %v315_v30  ;;  %v163_v46 = vld [vmem:[%s546_s4 + $0xe8] sm:$0xff]  ;;  %v325_v47 = vpack.c.bf16 %v145_v44, %v144_v43  ;;  %v24_v49 = vld [vmem:[%s542_s0] sm:$0xff]  ;;  %v164_v55 = vld [vmem:[%s546_s4 + $0xf0] sm:$0xff]  ;;  %v42_v63 = vsub.s32 0, %v41_v62  ;;  %v46_v1 = vsub.s32 1, %v41_v62 }
  0x12   :  { %v327_v48 = vpack.c.bf16 %v163_v46, %v162_v45  ;;  %v146_v52 = vld [vmem:[%s546_s4 + $0x60] sm:$0xff]  ;;  %v147_v53 = vld [vmem:[%s546_s4 + $0x68] sm:$0xff]  ;;  %v165_v56 = vld [vmem:[%s546_s4 + $0xf8] sm:$0xff] }
  0x13   :  { %v329_v54 = vpack.c.bf16 %v147_v53, %v146_v52  ;;  %v331_v57 = vpack.c.bf16 %v165_v56, %v164_v55  ;;  %v148_v58 = vld [vmem:[%s546_s4 + $0x70] sm:$0xff]  ;;  %v149_v59 = vld [vmem:[%s546_s4 + $0x78] sm:$0xff]  ;;  %v38_v0 = vld [vmem:[%s545_s3] sm:$0x3]  ;;  %s366_s3 = smov [#allocation2]  }
  0x14   :  { %318 = vmatpush3.bf16.msra.mxu1 %v317_v35  ;;  %v333_v60 = vpack.c.bf16 %v149_v59, %v148_v58  ;;  %v43_v2 = vrot.slane %v38_v0, %v42_v63  ;;  %v47_v3 = vrot.slane %v38_v0, %v46_v1  ;;  %v263_v11 = vld [vmem:[%s547_s5] ss:$0 sm:$0xff]  ;;  %s252_s26 = sshll.u32 %s366_s3, 4  ;;  %s253_s26 = int_to_ptr.vmem [resolvable:$true] %s252_s26 }
  0x15   :  { %320 = vmatprep.subr.bf16.mxu1 %v319_v36  ;;  %s340_s27 = scalar_lea.vmem %s253_s26, 128  ;;  %p345_p1 = scmp.lt.s32.totalorder %s253_s26, %s253_s26 }
  0x16   :  { %p341_p0 = scmp.ne.s32.totalorder %s253_s26, %s340_s27  ;;  %p346_p2 = scmp.lt.s32.totalorder %s340_s27, %s340_s27 }
  0x18   :  { %322 = vmatpush3.bf16.msra.mxu1 %v321_v41  ;;  %p347_p3 = por %p346_p2, %p345_p1 }
  0x19   :  { %324 = vmatprep.subr.bf16.mxu1 %v323_v42 }
  0x1a   :  { %p348_p4 = pnand %p347_p3, %p341_p0 }
  0x1c   :  { %326 = vmatpush3.bf16.msra.mxu1 %v325_v47 }
  0x1d   :  { %328 = vmatprep.subr.bf16.mxu1 %v327_v48 }
  0x20   :  { %330 = vmatpush3.bf16.msra.mxu1 %v329_v54 }
  0x21   :  { %332 = vmatprep.subr.bf16.mxu1 %v331_v57 }
  0x24   :  { %334 = vmatpush3.bf16.msra.mxu1 %v333_v60 }
  0x74   :  { %v28_v50 = vpop.permute.xlu0 %27 }
  0x75   :  { %v31_v51 = vsel %vm30_vm1, %v24_v49, %v28_v50 }
  0x76   :  { %262 = vmatmul.mubr.msk.f32.vlgmr.msra.gmra.mrb[0].mxu0 %vm50_vm2, %v31_v51 }
 0x149   :  { %v127_v4 = vpop.f32.mrb[0].mxu0 }
 0x14a   :  { %v128_v5 = vadd.f32 %v127_v4, %v43_v2  ;;  %v129_v6 = vpop.f32.mrb[1].mxu0 }
 0x14b   :  { %v130_v7 = vadd.f32 %v129_v6, %v47_v3 }
 0x14c   :  { %v132_v9 = vmax.f32 %v128_v5, 0.0 }
 0x14d   :  { %v133_v8 = vmax.f32 %v130_v7, 0.0 }
 0x14f   :  { %237 = vmatprep.mubr.f32.mxu1 %v133_v8 }
 0x150   :  { %238 = vmatmul.mubr.f32.vlgmr.msra.gmra.mrb[0].mxu1 %v132_v9 }
 0x223   :  { %v296_v10 = vpop.f32.mrb[0].mxu1 }
 0x224   :  { %v297_v12 = vpop.f32.mrb[1].mxu1 }
 0x225   :  { %v298_v13 = vadd.f32 %v297_v12, %v296_v10 }
 0x227   :  { %v240_v14 = vadd.f32 %v298_v13, %v263_v11 }
 0x229   :  { %338 = vtanh.f32 %v240_v14 }
 0x233   :  { %v339_v15 = vpop.eup %338 }
 0x234   :  { %v244_v16 = vmul.f32 0.05, %v339_v15 }
 0x236   :  { %245 = vst [vmem:[#allocation2] sm:$0xff] %v244_v16 }
 0x237   :  { %351 = shalt.err (!%p348_p4)
}
 0x238   :  { %s352_s5 = scalar_lea.hbm %s548_s6, 128 }
 0x239   :  { %p353_p5 = scmp.ne.s32.totalorder %s548_s6, %s352_s5  ;;  %p356_p6 = scmp.lt.u32.totalorder %s352_s5, %s548_s6 }
 0x23b   :  { %p358_p7 = pnand %p356_p6, %p353_p5 }
 0x23d   :  { %361 = shalt.err (!%p358_p7)
}
 0x23e   :  { %255 = dma.vmem_to_hbm [thread:$0]  %s253_s26, 128, %s548_s6, [#allocation3]  }
 0x23f   :  { %362 = dma.done.wait [#allocation3], 128  }
 0x240   :  { %363 = vsyncadd [#allocation3], 4294967168 }
 0x241   :  { %259 = vsyncpa [#allocation3], 1 }

</bundles_post_ra>
